<compile_context>
chip_gen: v7x
topology: tpu7x:2x2x1
jax: 0.10.0
libtpu: 0.0.40
codegen_flags: <defaults>
</compile_context>

<pallas_src>
import jax
import jax.numpy as jnp
from jax.experimental import pallas as pl
from jax.experimental.pallas import tpu as pltpu


INPUT_DIMS = 156
HIDDEN_DIMS = [128, 128]
D_PAD = 256           # feature dim padded up to a multiple of 128 lanes
TILE_B_MAX = 512      # batch tile (multiple of 8); small enough for v5e/v7x VMEM


def _round_up(x, m):
    return ((x + m - 1) // m) * m


def _prelu(x, alpha):
    return jnp.maximum(x, 0.0) + alpha * jnp.minimum(x, 0.0)


def ama_kernel(x_ref,
               w_e1, b_e1, w_e2, b_e2,      # encoders (weights bf16, biases f32)
               w_dp, b_dp,                  # fused decoder-1 + prediction head
               w_d2, b_d2,                  # decoder-2 (output padded to D_PAD)
               alphas_ref,                  # SMEM: [alpha_shared, alpha_final]
               out_ref, latent_ref):
    a = alphas_ref[0]
    a_fin = alphas_ref[1]
    h0 = w_e1.shape[1]                      # 128

    x = x_ref[...]                          # (TB, D_PAD) bf16

    # --- encoders (Dropout is identity at inference) ---
    h = jnp.dot(x, w_e1[...], preferred_element_type=jnp.float32) + b_e1[...]
    h = _prelu(h, a)
    h = jnp.dot(h.astype(jnp.bfloat16), w_e2[...],
                preferred_element_type=jnp.float32) + b_e2[...]
    h = _prelu(h, a)

    # --- fused decoder-1 (cols :h0) + prediction head (col h0) -> one 256-wide pass ---
    fused = jnp.dot(h.astype(jnp.bfloat16), w_dp[...],
                    preferred_element_type=jnp.float32) + b_dp[...]
    z = _prelu(fused[:, :h0], a)
    out_ref[...] = _prelu(fused[:, h0:], a_fin)     # lane-dense (TB, 128) store

    # --- decoder-2 (reconstruction, lane-padded to D_PAD) ---
    z = jnp.dot(z.astype(jnp.bfloat16), w_d2[...],
                preferred_element_type=jnp.float32) + b_d2[...]
    latent_ref[...] = _prelu(z, a)


def init_params(key, input_dims=INPUT_DIMS, hidden_dims=HIDDEN_DIMS):
    """Deterministic parameter init (uniform +-1/sqrt(fan_in), like nn.Linear)."""
    def linear(key, fan_in, fan_out):
        kw, kb = jax.random.split(key)
        bound = 1.0 / jnp.sqrt(float(fan_in))
        w = jax.random.uniform(kw, (fan_in, fan_out), jnp.float32, -bound, bound)
        b = jax.random.uniform(kb, (1, fan_out), jnp.float32, -bound, bound)
        return w, b

    keys = jax.random.split(key, 5)
    h0, h1 = hidden_dims
    w_e1, b_e1 = linear(keys[0], input_dims, h0)
    w_e2, b_e2 = linear(keys[1], h0, h1)
    # decoders are built by insert(0, ...) so order is [Linear(h1,h0), Linear(h0,in)]
    w_d1, b_d1 = linear(keys[2], h1, h0)
    w_d2, b_d2 = linear(keys[3], h0, input_dims)
    w_p, b_p = linear(keys[4], h1, 1)
    a_shared = jnp.full((1, 1), 0.25, jnp.float32)   # nn.PReLU() default init
    a_final = jnp.full((1, 1), 0.25, jnp.float32)
    return (w_e1, b_e1, w_e2, b_e2, w_d1, b_d1, w_d2, b_d2, w_p, b_p,
            a_shared, a_final)


def prepare_params(params, input_dims=INPUT_DIMS, d_pad=D_PAD):
    """One-time packing: pad to lane-friendly shapes, fuse dec-1 + head, cast bf16."""
    (w_e1, b_e1, w_e2, b_e2, w_d1, b_d1, w_d2, b_d2, w_p, b_p,
     a_shared, a_final) = params
    bf = jnp.bfloat16
    h0 = w_e1.shape[1]
    h1 = w_d1.shape[0]

    # encoder-1: zero-pad K dim 156 -> 256
    w_e1p = jnp.zeros((d_pad, h0), jnp.float32).at[:input_dims].set(w_e1).astype(bf)

    # fused decoder-1 + prediction head: (h1, 2*h0), head occupies column h0
    w_dp = jnp.zeros((h1, 2 * h0), jnp.float32)
    w_dp = w_dp.at[:, :h0].set(w_d1).at[:, h0:h0 + 1].set(w_p).astype(bf)
    b_dp = jnp.zeros((1, 2 * h0), jnp.float32)
    b_dp = b_dp.at[:, :h0].set(b_d1).at[:, h0:h0 + 1].set(b_p)

    # decoder-2: zero-pad N dim 156 -> 256
    w_d2p = jnp.zeros((h0, d_pad), jnp.float32).at[:, :input_dims].set(w_d2).astype(bf)
    b_d2p = jnp.zeros((1, d_pad), jnp.float32).at[:, :input_dims].set(b_d2)

    alphas = jnp.array([a_shared[0, 0], a_final[0, 0]], jnp.float32)
    return (w_e1p, b_e1, w_e2.astype(bf), b_e2, w_dp, b_dp, w_d2p, b_d2p, alphas)


@jax.jit
def ama_forward(features, prepped):
    (w_e1p, b_e1, w_e2, b_e2, w_dp, b_dp, w_d2p, b_d2p, alphas) = prepped
    B, D = features.shape
    d_pad = w_e1p.shape[0]
    h0 = w_e1p.shape[1]
    n_out = w_dp.shape[1] - h0                    # lane-padded head width (128)

    tile_b = min(TILE_B_MAX, _round_up(B, 8))
    b_pad = _round_up(B, tile_b)

    # Pad batch to the tile and features 156 -> 256; cast activations to bf16
    # (bf16 MXU path, f32 accumulation inside the kernel).
    x = jnp.zeros((b_pad, d_pad), jnp.bfloat16)
    x = x.at[:B, :D].set(features.astype(jnp.bfloat16))

    def _tiled(shape):
        return pl.BlockSpec(shape, lambda i: (i, 0))

    def _resident(arr):
        return pl.BlockSpec(arr.shape, lambda i: (0, 0))

    in_specs = [
        _tiled((tile_b, d_pad)),                                  # x
        _resident(w_e1p), _resident(b_e1),
        _resident(w_e2), _resident(b_e2),
        _resident(w_dp), _resident(b_dp),
        _resident(w_d2p), _resident(b_d2p),
        pl.BlockSpec(memory_space=pltpu.MemorySpace.SMEM),        # alphas
    ]
    out_specs = (
        _tiled((tile_b, n_out)),                                  # head (lane-dense)
        _tiled((tile_b, d_pad)),                                  # latent (padded)
    )

    out_full, latent_full = pl.pallas_call(
        ama_kernel,
        grid=(b_pad // tile_b,),
        in_specs=in_specs,
        out_specs=out_specs,
        out_shape=(jax.ShapeDtypeStruct((b_pad, n_out), jnp.float32),
                   jax.ShapeDtypeStruct((b_pad, d_pad), jnp.float32)),
        compiler_params=pltpu.CompilerParams(
            dimension_semantics=("parallel",)),
    )(x, w_e1p, b_e1, w_e2, b_e2, w_dp, b_dp, w_d2p, b_d2p, alphas)

    out = out_full[:B, :1]
    latent = latent_full[:B, :D]
    origin_features = features  # copy.deepcopy(features) -> functional copy in JAX
    return {"output": out,
            "uncertainty": {"index_query": (origin_features, latent)}}


def ama_forward_ref(features, params):
    """Pure-JAX reference mirroring the kernel numerics (bf16 operands, f32 acc)."""
    (w_e1, b_e1, w_e2, b_e2, w_d1, b_d1, w_d2, b_d2, w_p, b_p,
     a_shared, a_final) = params
    bf = jnp.bfloat16

    def mm(x, w):
        return jnp.dot(x.astype(bf), w.astype(bf),
                       preferred_element_type=jnp.float32)

    a = a_shared[0, 0]
    h = _prelu(mm(features, w_e1) + b_e1, a)
    h = _prelu(mm(h, w_e2) + b_e2, a)
    z = _prelu(mm(h, w_d1) + b_d1, a)
    z = _prelu(mm(z, w_d2) + b_d2, a)
    out = _prelu(mm(h, w_p) + b_p, a_final[0, 0])
    return out, z


if __name__ == "__main__":
    key = jax.random.PRNGKey(0)
    k_x, k_p = jax.random.split(key)

    batch = 8
    features = jax.random.normal(k_x, (batch, INPUT_DIMS), jnp.float32)
    params = init_params(k_p)
    prepped = prepare_params(params)

    result = ama_forward(features, prepped)
    out = jax.block_until_ready(result["output"])
    origin, latent = result["uncertainty"]["index_query"]
    latent = jax.block_until_ready(latent)

    # Validate against pure-JAX reference (same bf16-weight quantization).
    out_ref, latent_ref = ama_forward_ref(features, params)
    assert out.shape == (batch, 1)
    assert latent.shape == (batch, INPUT_DIMS)
    assert origin.shape == (batch, INPUT_DIMS)
    assert jnp.allclose(out, out_ref, atol=2e-3, rtol=2e-3), \
        float(jnp.max(jnp.abs(out - out_ref)))
    assert jnp.allclose(latent, latent_ref, atol=2e-3, rtol=2e-3), \
        float(jnp.max(jnp.abs(latent - latent_ref)))
    assert jnp.allclose(origin, features)

    print("KERNEL_OK")
</pallas_src>

<mosaic_0001>
module attributes {stable_mosaic.version = 11 : i64} {
  func.func @ama_kernel(%arg0: i32, %arg1: memref<8x256xbf16, #tpu.memory_space<vmem>>, %arg2: memref<256x128xbf16, #tpu.memory_space<vmem>>, %arg3: memref<1x128xf32, #tpu.memory_space<vmem>>, %arg4: memref<128x128xbf16, #tpu.memory_space<vmem>>, %arg5: memref<1x128xf32, #tpu.memory_space<vmem>>, %arg6: memref<128x256xbf16, #tpu.memory_space<vmem>>, %arg7: memref<1x256xf32, #tpu.memory_space<vmem>>, %arg8: memref<128x256xbf16, #tpu.memory_space<vmem>>, %arg9: memref<1x256xf32, #tpu.memory_space<vmem>>, %arg10: memref<2xf32, #tpu.memory_space<smem>>, %arg11: memref<8x128xf32, #tpu.memory_space<vmem>>, %arg12: memref<8x256xf32, #tpu.memory_space<vmem>>) attributes {dimension_semantics = [#tpu.dimension_semantics<parallel>], iteration_bounds = array<i64: 1>, scalar_prefetch = 0 : i64, scratch_operands = 0 : i64, tpu.core_type = #tpu.core_type<tc>, window_params = [{transform_indices = @transform_0, window_bounds = array<i64: 8, 256>}, {pipeline_mode = #tpu.pipeline_mode<synchronous>, transform_indices = @transform_1, window_bounds = array<i64: 256, 128>}, {pipeline_mode = #tpu.pipeline_mode<synchronous>, transform_indices = @transform_2, window_bounds = array<i64: 1, 128>}, {pipeline_mode = #tpu.pipeline_mode<synchronous>, transform_indices = @transform_3, window_bounds = array<i64: 128, 128>}, {pipeline_mode = #tpu.pipeline_mode<synchronous>, transform_indices = @transform_4, window_bounds = array<i64: 1, 128>}, {pipeline_mode = #tpu.pipeline_mode<synchronous>, transform_indices = @transform_5, window_bounds = array<i64: 128, 256>}, {pipeline_mode = #tpu.pipeline_mode<synchronous>, transform_indices = @transform_6, window_bounds = array<i64: 1, 256>}, {pipeline_mode = #tpu.pipeline_mode<synchronous>, transform_indices = @transform_7, window_bounds = array<i64: 128, 256>}, {pipeline_mode = #tpu.pipeline_mode<synchronous>, transform_indices = @transform_8, window_bounds = array<i64: 1, 256>}, {transform_indices = @transform_9, window_bounds = array<i64: 2>}, {transform_indices = @transform_10, window_bounds = array<i64: 8, 128>}, {transform_indices = @transform_11, window_bounds = array<i64: 8, 256>}]} {
    %c0 = arith.constant 0 : index
    %0 = memref.load %arg10[%c0] : memref<2xf32, #tpu.memory_space<smem>>
    %c1 = arith.constant 1 : index
    %1 = memref.load %arg10[%c1] : memref<2xf32, #tpu.memory_space<smem>>
    %c0_0 = arith.constant 0 : index
    %c0_1 = arith.constant 0 : index
    %2 = vector.load %arg1[%c0_0, %c0_1] : memref<8x256xbf16, #tpu.memory_space<vmem>>, vector<8x256xbf16>
    %c0_2 = arith.constant 0 : index
    %c0_3 = arith.constant 0 : index
    %3 = vector.load %arg2[%c0_2, %c0_3] : memref<256x128xbf16, #tpu.memory_space<vmem>>, vector<256x128xbf16>
    %cst = arith.constant dense<0.000000e+00> : vector<8x128xf32>
    %4 = tpu.matmul %2, %3, %cst {dimension_numbers = #tpu.dot_dimension_numbers<[1], [0], [0], [1], [0, 0, 1, 1], [], []>} : vector<8x256xbf16>, vector<256x128xbf16>, vector<8x128xf32> -> vector<8x128xf32>
    %c0_4 = arith.constant 0 : index
    %c0_5 = arith.constant 0 : index
    %5 = vector.load %arg3[%c0_4, %c0_5] : memref<1x128xf32, #tpu.memory_space<vmem>>, vector<1x128xf32>
    %6 = vector.broadcast %5 : vector<1x128xf32> to vector<8x128xf32>
    %7 = arith.addf %4, %6 : vector<8x128xf32>
    %cst_6 = arith.constant 0.000000e+00 : f32
    %8 = vector.broadcast %cst_6 : f32 to vector<8x128xf32>
    %9 = arith.maximumf %7, %8 : vector<8x128xf32>
    %cst_7 = arith.constant 0.000000e+00 : f32
    %10 = vector.broadcast %cst_7 : f32 to vector<8x128xf32>
    %11 = arith.minimumf %7, %10 : vector<8x128xf32>
    %12 = vector.broadcast %0 : f32 to vector<8x128xf32>
    %13 = arith.mulf %12, %11 : vector<8x128xf32>
    %14 = arith.addf %9, %13 : vector<8x128xf32>
    %15 = arith.truncf %14 : vector<8x128xf32> to vector<8x128xbf16>
    %c0_8 = arith.constant 0 : index
    %c0_9 = arith.constant 0 : index
    %16 = vector.load %arg4[%c0_8, %c0_9] : memref<128x128xbf16, #tpu.memory_space<vmem>>, vector<128x128xbf16>
    %cst_10 = arith.constant dense<0.000000e+00> : vector<8x128xf32>
    %17 = tpu.matmul %15, %16, %cst_10 {dimension_numbers = #tpu.dot_dimension_numbers<[1], [0], [0], [1], [0, 0, 1, 1], [], []>} : vector<8x128xbf16>, vector<128x128xbf16>, vector<8x128xf32> -> vector<8x128xf32>
    %c0_11 = arith.constant 0 : index
    %c0_12 = arith.constant 0 : index
    %18 = vector.load %arg5[%c0_11, %c0_12] : memref<1x128xf32, #tpu.memory_space<vmem>>, vector<1x128xf32>
    %19 = vector.broadcast %18 : vector<1x128xf32> to vector<8x128xf32>
    %20 = arith.addf %17, %19 : vector<8x128xf32>
    %cst_13 = arith.constant 0.000000e+00 : f32
    %21 = vector.broadcast %cst_13 : f32 to vector<8x128xf32>
    %22 = arith.maximumf %20, %21 : vector<8x128xf32>
    %cst_14 = arith.constant 0.000000e+00 : f32
    %23 = vector.broadcast %cst_14 : f32 to vector<8x128xf32>
    %24 = arith.minimumf %20, %23 : vector<8x128xf32>
    %25 = vector.broadcast %0 : f32 to vector<8x128xf32>
    %26 = arith.mulf %25, %24 : vector<8x128xf32>
    %27 = arith.addf %22, %26 : vector<8x128xf32>
    %28 = arith.truncf %27 : vector<8x128xf32> to vector<8x128xbf16>
    %c0_15 = arith.constant 0 : index
    %c0_16 = arith.constant 0 : index
    %29 = vector.load %arg6[%c0_15, %c0_16] : memref<128x256xbf16, #tpu.memory_space<vmem>>, vector<128x256xbf16>
    %cst_17 = arith.constant dense<0.000000e+00> : vector<8x256xf32>
    %30 = tpu.matmul %28, %29, %cst_17 {dimension_numbers = #tpu.dot_dimension_numbers<[1], [0], [0], [1], [0, 0, 1, 1], [], []>} : vector<8x128xbf16>, vector<128x256xbf16>, vector<8x256xf32> -> vector<8x256xf32>
    %c0_18 = arith.constant 0 : index
    %c0_19 = arith.constant 0 : index
    %31 = vector.load %arg7[%c0_18, %c0_19] : memref<1x256xf32, #tpu.memory_space<vmem>>, vector<1x256xf32>
    %32 = vector.broadcast %31 : vector<1x256xf32> to vector<8x256xf32>
    %33 = arith.addf %30, %32 : vector<8x256xf32>
    %34 = vector.extract_strided_slice %33 {offsets = [0, 0], sizes = [8, 128], strides = [1, 1]} : vector<8x256xf32> to vector<8x128xf32>
    %cst_20 = arith.constant 0.000000e+00 : f32
    %35 = vector.broadcast %cst_20 : f32 to vector<8x128xf32>
    %36 = arith.maximumf %34, %35 : vector<8x128xf32>
    %cst_21 = arith.constant 0.000000e+00 : f32
    %37 = vector.broadcast %cst_21 : f32 to vector<8x128xf32>
    %38 = arith.minimumf %34, %37 : vector<8x128xf32>
    %39 = vector.broadcast %0 : f32 to vector<8x128xf32>
    %40 = arith.mulf %39, %38 : vector<8x128xf32>
    %41 = arith.addf %36, %40 : vector<8x128xf32>
    %42 = vector.extract_strided_slice %33 {offsets = [0, 128], sizes = [8, 128], strides = [1, 1]} : vector<8x256xf32> to vector<8x128xf32>
    %cst_22 = arith.constant 0.000000e+00 : f32
    %43 = vector.broadcast %cst_22 : f32 to vector<8x128xf32>
    %44 = arith.maximumf %42, %43 : vector<8x128xf32>
    %cst_23 = arith.constant 0.000000e+00 : f32
    %45 = vector.broadcast %cst_23 : f32 to vector<8x128xf32>
    %46 = arith.minimumf %42, %45 : vector<8x128xf32>
    %47 = vector.broadcast %1 : f32 to vector<8x128xf32>
    %48 = arith.mulf %47, %46 : vector<8x128xf32>
    %49 = arith.addf %44, %48 : vector<8x128xf32>
    %c0_24 = arith.constant 0 : index
    %c0_25 = arith.constant 0 : index
    %50 = vector.load %arg11[%c0_24, %c0_25] : memref<8x128xf32, #tpu.memory_space<vmem>>, vector<8x128xf32>
    tpu.vector_store %arg11[%c0_24, %c0_25], %49 {strides = array<i32>} : memref<8x128xf32, #tpu.memory_space<vmem>>, vector<8x128xf32>,
    %51 = arith.truncf %41 : vector<8x128xf32> to vector<8x128xbf16>
    %c0_26 = arith.constant 0 : index
    %c0_27 = arith.constant 0 : index
    %52 = vector.load %arg8[%c0_26, %c0_27] : memref<128x256xbf16, #tpu.memory_space<vmem>>, vector<128x256xbf16>
    %cst_28 = arith.constant dense<0.000000e+00> : vector<8x256xf32>
    %53 = tpu.matmul %51, %52, %cst_28 {dimension_numbers = #tpu.dot_dimension_numbers<[1], [0], [0], [1], [0, 0, 1, 1], [], []>} : vector<8x128xbf16>, vector<128x256xbf16>, vector<8x256xf32> -> vector<8x256xf32>
    %c0_29 = arith.constant 0 : index
    %c0_30 = arith.constant 0 : index
    %54 = vector.load %arg9[%c0_29, %c0_30] : memref<1x256xf32, #tpu.memory_space<vmem>>, vector<1x256xf32>
    %55 = vector.broadcast %54 : vector<1x256xf32> to vector<8x256xf32>
    %56 = arith.addf %53, %55 : vector<8x256xf32>
    %cst_31 = arith.constant 0.000000e+00 : f32
    %57 = vector.broadcast %cst_31 : f32 to vector<8x256xf32>
    %58 = arith.maximumf %56, %57 : vector<8x256xf32>
    %cst_32 = arith.constant 0.000000e+00 : f32
    %59 = vector.broadcast %cst_32 : f32 to vector<8x256xf32>
    %60 = arith.minimumf %56, %59 : vector<8x256xf32>
    %61 = vector.broadcast %0 : f32 to vector<8x256xf32>
    %62 = arith.mulf %61, %60 : vector<8x256xf32>
    %63 = arith.addf %58, %62 : vector<8x256xf32>
    %c0_33 = arith.constant 0 : index
    %c0_34 = arith.constant 0 : index
    %64 = vector.load %arg12[%c0_33, %c0_34] : memref<8x256xf32, #tpu.memory_space<vmem>>, vector<8x256xf32>
    tpu.vector_store %arg12[%c0_33, %c0_34], %63 {strides = array<i32>} : memref<8x256xf32, #tpu.memory_space<vmem>>, vector<8x256xf32>,
    return
  }
  func.func @transform_0(%arg0: i32) -> (i32, i32) {
    %c0_i32 = arith.constant 0 : i32
    %c0_i32_0 = arith.constant 0 : i32
    return %arg0, %c0_i32 : i32, i32
  }
  func.func @transform_1(%arg0: i32) -> (i32, i32) {
    %c0_i32 = arith.constant 0 : i32
    %c0_i32_0 = arith.constant 0 : i32
    %c0_i32_1 = arith.constant 0 : i32
    return %c0_i32, %c0_i32_0 : i32, i32
  }
  func.func @transform_2(%arg0: i32) -> (i32, i32) {
    %c0_i32 = arith.constant 0 : i32
    %c0_i32_0 = arith.constant 0 : i32
    %c0_i32_1 = arith.constant 0 : i32
    return %c0_i32, %c0_i32_0 : i32, i32
  }
  func.func @transform_3(%arg0: i32) -> (i32, i32) {
    %c0_i32 = arith.constant 0 : i32
    %c0_i32_0 = arith.constant 0 : i32
    %c0_i32_1 = arith.constant 0 : i32
    return %c0_i32, %c0_i32_0 : i32, i32
  }
  func.func @transform_4(%arg0: i32) -> (i32, i32) {
    %c0_i32 = arith.constant 0 : i32
    %c0_i32_0 = arith.constant 0 : i32
    %c0_i32_1 = arith.constant 0 : i32
    return %c0_i32, %c0_i32_0 : i32, i32
  }
  func.func @transform_5(%arg0: i32) -> (i32, i32) {
    %c0_i32 = arith.constant 0 : i32
    %c0_i32_0 = arith.constant 0 : i32
    %c0_i32_1 = arith.constant 0 : i32
    return %c0_i32, %c0_i32_0 : i32, i32
  }
  func.func @transform_6(%arg0: i32) -> (i32, i32) {
    %c0_i32 = arith.constant 0 : i32
    %c0_i32_0 = arith.constant 0 : i32
    %c0_i32_1 = arith.constant 0 : i32
    return %c0_i32, %c0_i32_0 : i32, i32
  }
  func.func @transform_7(%arg0: i32) -> (i32, i32) {
    %c0_i32 = arith.constant 0 : i32
    %c0_i32_0 = arith.constant 0 : i32
    %c0_i32_1 = arith.constant 0 : i32
    return %c0_i32, %c0_i32_0 : i32, i32
  }
  func.func @transform_8(%arg0: i32) -> (i32, i32) {
    %c0_i32 = arith.constant 0 : i32
    %c0_i32_0 = arith.constant 0 : i32
    %c0_i32_1 = arith.constant 0 : i32
    return %c0_i32, %c0_i32_0 : i32, i32
  }
  func.func @transform_9(%arg0: i32) -> i32 {
    %c0_i32 = arith.constant 0 : i32
    %c0_i32_0 = arith.constant 0 : i32
    return %c0_i32 : i32
  }
  func.func @transform_10(%arg0: i32) -> (i32, i32) {
    %c0_i32 = arith.constant 0 : i32
    %c0_i32_0 = arith.constant 0 : i32
    return %arg0, %c0_i32 : i32, i32
  }
  func.func @transform_11(%arg0: i32) -> (i32, i32) {
    %c0_i32 = arith.constant 0 : i32
    %c0_i32_0 = arith.constant 0 : i32
    return %arg0, %c0_i32 : i32, i32
  }
}

</mosaic_0001>

<bundles_post_ra>
// kernel: ama_forward.1
= control target key start
LH: loop header
LB: loop body
LE: loop exit
PB: predicated region body
PF: predicated region fallthrough
CT: control target
= control target key end

     0   :  { %17 = vsyncpa [#allocation3], 0  ;;  %s1254_s0 = inlined_call_operand.vmem [shape: bf16[8,256], index: 0, kind: input, shape index: {}]   ;;  %s1255_s1 = inlined_call_operand.hbm [shape: bf16[256,128], index: 1, kind: input, shape index: {}]   ;;  %s1256_s2 = inlined_call_operand.vmem [shape: f32[1,128], index: 2, kind: input, shape index: {}]   ;;  %s1257_s3 = inlined_call_operand.hbm [shape: bf16[128,128], index: 3, kind: input, shape index: {}]   ;;  %s1258_s4 = inlined_call_operand.vmem [shape: f32[1,128], index: 4, kind: input, shape index: {}]   ;;  %s1259_s5 = inlined_call_operand.hbm [shape: bf16[128,256], index: 5, kind: input, shape index: {}]   ;;  %s1260_s6 = inlined_call_operand.vmem [shape: f32[1,256], index: 6, kind: input, shape index: {}]   ;;  %s1261_s7 = inlined_call_operand.hbm [shape: bf16[128,256], index: 7, kind: input, shape index: {}]   ;;  %s1262_s8 = inlined_call_operand.vmem [shape: f32[1,256], index: 8, kind: input, shape index: {}]   ;;  %s1263_s9 = inlined_call_operand.vmem [shape: f32[2], index: 9, kind: input, shape index: {}]   ;;  %s1264_s10 = inlined_call_operand.vmem [shape: f32[8,128], index: 10, kind: output, shape index: {0}]   ;;  %s1265_s11 = inlined_call_operand.hbm [shape: f32[8,256], index: 11, kind: output, shape index: {1}]  }
   0x1   :  { %18 = vsyncpa [#allocation7], 0 }
   0x2   :  { %19 = vsyncpa [#allocation10], 0 }
   0x3   :  { %20 = vsyncpa [#allocation5], 0 }
   0x4   :  { %21 = vsyncpa [#allocation4], 0  ;;  %s1086_s17 = smov [#allocation6]   ;;  %s1087_s19 = smov [#allocation2]  }
   0x5   :  { %s43_s18 = sshll.u32 %s1086_s17, 4  ;;  %s29_s20 = sshll.u32 %s1087_s19, 4  ;;  %s44_s18 = int_to_ptr.vmem [resolvable:$true] %s43_s18  ;;  %s1159_s20 = int_to_ptr.vmem [resolvable:$true] %s29_s20 }
   0x6   :  { %s954_s23 = scalar_lea.hbm %s1257_s3, 1024 }
   0x7   :  { %p955_p0 = scmp.ne.s32.totalorder %s1257_s3, %s954_s23  ;;  %p958_p1 = scmp.lt.u32.totalorder %s954_s23, %s1257_s3 }
   0x9   :  { %p960_p2 = pnand %p958_p1, %p955_p0 }
   0xb   :  { %963 = shalt.err (!%p960_p2)
}
   0xc   :  { %s964_s28 = scalar_lea.vmem %s44_s18, 1024  ;;  %p969_p4 = scmp.lt.s32.totalorder %s44_s18, %s44_s18 }
   0xd   :  { %p965_p3 = scmp.ne.s32.totalorder %s44_s18, %s964_s28  ;;  %p970_p5 = scmp.lt.s32.totalorder %s964_s28, %s964_s28 }
   0xf   :  { %p971_p6 = por %p970_p5, %p969_p4 }
  0x11   :  { %p972_p7 = pnand %p971_p6, %p965_p3 }
  0x13   :  { %975 = shalt.err (!%p972_p7)
}
  0x14   :  { %s1088_s29 = smov 64   ;;  %s1089_s30 = smov 4  }
  0x15   :  { %49 = dma.hbm_to_vmem [thread:$0]  %s1257_s3, 1024, %s44_s18, [#allocation7], %s1088_s29, %s1088_s29, %s1089_s30  }
  0x16   :  { %s976_s16 = scalar_lea.hbm %s1255_s1, 2048 }
  0x17   :  { %p977_p8 = scmp.ne.s32.totalorder %s1255_s1, %s976_s16  ;;  %p980_p9 = scmp.lt.u32.totalorder %s976_s16, %s1255_s1 }
  0x19   :  { %p982_p10 = pnand %p980_p9, %p977_p8 }
  0x1b   :  { %985 = shalt.err (!%p982_p10)
}
  0x1c   :  { %s986_s23 = scalar_lea.vmem %s1159_s20, 2048  ;;  %p991_p12 = scmp.lt.s32.totalorder %s1159_s20, %s1159_s20 }
  0x1d   :  { %p987_p11 = scmp.ne.s32.totalorder %s1159_s20, %s986_s23  ;;  %p992_p13 = scmp.lt.s32.totalorder %s986_s23, %s986_s23 }
  0x1f   :  { %p993_p0 = por %p992_p13, %p991_p12 }
  0x21   :  { %p994_p1 = pnand %p993_p0, %p987_p11 }
  0x23   :  { %997 = shalt.err (!%p994_p1)
}
  0x24   :  { %35 = dma.hbm_to_vmem [thread:$0]  %s1255_s1, 2048, %s1159_s20, [#allocation3], %s1088_s29, %s1088_s29, %s1089_s30  }
  0x25   :  { %s1090_s24 = smov [#allocation8]   ;;  %s998_s28 = scalar_lea.hbm %s1259_s5, 2048 }
  0x26   :  { %s57_s25 = sshll.u32 %s1090_s24, 4  ;;  %p999_p2 = scmp.ne.s32.totalorder %s1259_s5, %s998_s28  ;;  %s58_s25 = int_to_ptr.vmem [resolvable:$true] %s57_s25 }
  0x27   :  { %p1002_p3 = scmp.lt.u32.totalorder %s998_s28, %s1259_s5 }
  0x29   :  { %p1004_p4 = pnand %p1002_p3, %p999_p2 }
  0x2b   :  { %1007 = shalt.err (!%p1004_p4)
}
  0x2c   :  { %s1008_s16 = scalar_lea.vmem %s58_s25, 2048  ;;  %p1013_p6 = scmp.lt.s32.totalorder %s58_s25, %s58_s25 }
  0x2d   :  { %p1009_p5 = scmp.ne.s32.totalorder %s58_s25, %s1008_s16  ;;  %p1014_p7 = scmp.lt.s32.totalorder %s1008_s16, %s1008_s16 }
  0x2f   :  { %p1015_p8 = por %p1014_p7, %p1013_p6 }
  0x31   :  { %p1016_p9 = pnand %p1015_p8, %p1009_p5 }
  0x33   :  { %1019 = shalt.err (!%p1016_p9)
}
  0x34   :  { %s1091_s1 = smov 128   ;;  %s1092_s20 = smov 8  }
  0x35   :  { %63 = dma.hbm_to_vmem [thread:$0]  %s1259_s5, 2048, %s58_s25, [#allocation7], %s1091_s1, %s1091_s1, %s1092_s20  }
  0x36   :  { %s1093_s17 = smov [#allocation9]   ;;  %s86_s23 = sshll.u32 %s1263_s9, 4  ;;  %s87_s23 = int_to_ptr.vmem [resolvable:$true] %s86_s23 }
  0x37   :  { %s71_s19 = sshll.u32 %s1093_s17, 4  ;;  %s1020_s24 = scalar_lea.hbm %s1261_s7, 2048  ;;  %s72_s19 = int_to_ptr.vmem [resolvable:$true] %s71_s19 }
  0x38   :  { %p1021_p10 = scmp.ne.s32.totalorder %s1261_s7, %s1020_s24  ;;  %p1024_p11 = scmp.lt.u32.totalorder %s1020_s24, %s1261_s7 }
  0x3a   :  { %p1026_p12 = pnand %p1024_p11, %p1021_p10 }
  0x3c   :  { %1029 = shalt.err (!%p1026_p12)
}
  0x3d   :  { %s1030_s5 = scalar_lea.vmem %s72_s19, 2048  ;;  %p1035_p0 = scmp.lt.s32.totalorder %s72_s19, %s72_s19 }
  0x3e   :  { %p1031_p13 = scmp.ne.s32.totalorder %s72_s19, %s1030_s5  ;;  %p1036_p1 = scmp.lt.s32.totalorder %s1030_s5, %s1030_s5 }
  0x40   :  { %p1037_p2 = por %p1036_p1, %p1035_p0 }
  0x42   :  { %p1038_p3 = pnand %p1037_p2, %p1031_p13 }
  0x44   :  { %1041 = shalt.err (!%p1038_p3)
}
  0x45   :  { %77 = dma.hbm_to_vmem [thread:$0]  %s1261_s7, 2048, %s72_s19, [#allocation10], %s1091_s1, %s1091_s1, %s1092_s20  }
  0x46   :  { %s1042_s13 = scalar_lea.vmem %s87_s23, 16  ;;  %p1047_p5 = scmp.lt.s32.totalorder %s87_s23, %s87_s23 }
  0x47   :  { %p1043_p4 = scmp.ne.s32.totalorder %s87_s23, %s1042_s13  ;;  %p1048_p6 = scmp.lt.s32.totalorder %s1042_s13, %s1042_s13 }
  0x49   :  { %p1049_p7 = por %p1048_p6, %p1047_p5 }
  0x4b   :  { %p1050_p8 = pnand %p1049_p7, %p1043_p4 }
  0x4d   :  { %1053 = shalt.err (!%p1050_p8)
}
  0x4e   :  { %s1094_s14 = smov [#allocation11]  }
  0x4f   :  { %89 = dma.vmem_to_smem %s87_s23, 16, %s1094_s14, [#allocation5]  }
  0x50   :  { %1076 = dma.done.wait [#allocation3], 2048  }
  0x51   :  { %1077 = vsyncadd [#allocation3], 4294965248 }
  0x52   :  { %1078 = dma.done.wait [#allocation7], 3072  }
  0x53   :  { %1079 = vsyncadd [#allocation7], 4294964224 }
  0x54   :  { %1080 = dma.done.wait [#allocation10], 2048  }
  0x55   :  { %1081 = vsyncadd [#allocation10], 4294965248 }
  0x56   :  { %1082 = dma.done.wait [#allocation5], 16  }
  0x57   :  { %1083 = vsyncadd [#allocation5], 4294967280 }
  0x58   :  { %105 = sfence }
  0x59   :  { %v880_v0 = vld [vmem:[#allocation2 + $0x40] sm:$0xff]   ;;  %v1095_v2 = vmov 0.0   ;;  %v882_v3 = vld [vmem:[#allocation2 + $0x48] sm:$0xff]   ;;  %v884_v5 = vld [vmem:[#allocation2 + $0x50] sm:$0xff]   ;;  %vm1096_vm0 = vmmov 0   ;;  %v1097_v57 = vmov 0  }
  0x5a   :  { %v881_v1 = vld [vmem:[#allocation2] sm:$0xff]   ;;  %847 = vmatprep.subr.bf16.mxu1 %v1095_v2  ;;  %816 = vmatprep.subr.bf16.mxu0 %v880_v0  ;;  %v883_v4 = vld [vmem:[#allocation2 + $0x8] sm:$0xff]   ;;  %v885_v6 = vld [vmem:[#allocation2 + $0x10] sm:$0xff]   ;;  %s755_s30 = sld [smem:[#allocation11 + $0x1]]  ;;  %s1098_s22 = smov [#allocation12]  }
  0x5b   :  { %817 = vmatpush3.bf16.msra.mxu0 %v881_v1  ;;  %v886_v7 = vld [vmem:[#allocation2 + $0x58] sm:$0xff]   ;;  %v888_v9 = vld [vmem:[#allocation2 + $0x60] sm:$0xff]   ;;  %v890_v11 = vld [vmem:[#allocation2 + $0x68] sm:$0xff]   ;;  %863 = vmatprep.mubr.msk.bf16.mxu1 %vm1096_vm0, %v1095_v2 }
  0x5c   :  { %818 = vmatprep.subr.bf16.mxu0 %v882_v3  ;;  %v887_v8 = vld [vmem:[#allocation2 + $0x18] sm:$0xff]   ;;  %v889_v10 = vld [vmem:[#allocation2 + $0x20] sm:$0xff]   ;;  %v891_v15 = vld [vmem:[#allocation2 + $0x28] sm:$0xff]  }
  0x5d   :  { %v109_v12 = vld [vmem:[%s1254_s0] sm:$0xff]  ;;  %v892_v16 = vld [vmem:[#allocation2 + $0x70] sm:$0xff]   ;;  %v899_v17 = vld [vmem:[#allocation6 + $0x8] sm:$0xff]   ;;  %s107_s0 = sld [smem:[#allocation11]] }
  0x5e   :  { %v758_v13 = vcombine.high %v109_v12, %v109_v12  ;;  %v898_v14 = vld [vmem:[#allocation6] sm:$0xff]   ;;  %v893_v18 = vld [vmem:[#allocation2 + $0x30] sm:$0xff]   ;;  %v894_v19 = vld [vmem:[#allocation2 + $0x78] sm:$0xff]   ;;  %v757_v23 = vcombine.low %v109_v12, %v109_v12 }
  0x5f   :  { %819 = vmatpush3.bf16.msra.mxu0 %v883_v4  ;;  %848 = vmatpush3.bf16.msra.mxu1 %v898_v14  ;;  %v900_v20 = vld [vmem:[#allocation6 + $0x10] sm:$0xff]   ;;  %v895_v21 = vld [vmem:[#allocation2 + $0x38] sm:$0xff]   ;;  %v902_v24 = vld [vmem:[#allocation6 + $0x20] sm:$0xff]  }
  0x60   :  { %820 = vmatprep.subr.bf16.mxu0 %v884_v5  ;;  %284 = vmatprep.mubr.bf16.mxu0 %v758_v13  ;;  %v901_v22 = vld [vmem:[#allocation6 + $0x18] sm:$0xff]   ;;  %v903_v25 = vld [vmem:[#allocation6 + $0x28] sm:$0xff]   ;;  %v904_v26 = vld [vmem:[#allocation6 + $0x30] sm:$0xff]  }
  0x61   :  { %849 = vmatprep.subr.bf16.mxu1 %v1095_v2  ;;  %v905_v27 = vld [vmem:[#allocation6 + $0x38] sm:$0xff]   ;;  %v906_v28 = vld [vmem:[#allocation8] ss:$8 sps:$4 sm:$0xff]   ;;  %v908_v29 = vld [vmem:[#allocation8 + $0x4] ss:$8 sps:$4 sm:$0xff]  }
  0x62   :  { %v911_v30 = vld [vmem:[#allocation8 + $0x14] ss:$8 sps:$4 sm:$0xff]   ;;  %v909_v31 = vld [vmem:[#allocation8 + $0x10] ss:$8 sps:$4 sm:$0xff]   ;;  %v914_v32 = vld [vmem:[#allocation8 + $0x24] ss:$8 sps:$4 sm:$0xff]  }
  0x63   :  { %821 = vmatpush3.bf16.msra.mxu0 %v885_v6  ;;  %850 = vmatpush3.bf16.msra.mxu1 %v899_v17  ;;  %v912_v33 = vld [vmem:[#allocation8 + $0x20] ss:$8 sps:$4 sm:$0xff]   ;;  %v917_v34 = vld [vmem:[#allocation8 + $0x34] ss:$8 sps:$4 sm:$0xff]   ;;  %v915_v35 = vld [vmem:[#allocation8 + $0x30] ss:$8 sps:$4 sm:$0xff]   ;;  %v1223_v47 = vstv %s107_s0 }
  0x64   :  { %822 = vmatprep.subr.bf16.mxu0 %v886_v7  ;;  %851 = vmatprep.subr.bf16.mxu1 %v1095_v2  ;;  %v920_v36 = vld [vmem:[#allocation8 + $0x44] ss:$8 sps:$4 sm:$0xff]   ;;  %v918_v37 = vld [vmem:[#allocation8 + $0x40] ss:$8 sps:$4 sm:$0xff]   ;;  %v923_v38 = vld [vmem:[#allocation8 + $0x54] ss:$8 sps:$4 sm:$0xff]  }
  0x65   :  { %v921_v39 = vld [vmem:[#allocation8 + $0x50] ss:$8 sps:$4 sm:$0xff]   ;;  %v756_v41 = vld [vmem:[%s1256_s2] ss:$0 sm:$0xff]  ;;  %v926_v53 = vld [vmem:[#allocation8 + $0x64] ss:$8 sps:$4 sm:$0xff]  }
  0x66   :  { %v924_v54 = vld [vmem:[#allocation8 + $0x60] ss:$8 sps:$4 sm:$0xff]   ;;  %v929_v55 = vld [vmem:[#allocation8 + $0x74] ss:$8 sps:$4 sm:$0xff]   ;;  %v927_v56 = vld [vmem:[#allocation8 + $0x70] ss:$8 sps:$4 sm:$0xff]  }
  0x67   :  { %823 = vmatpush3.bf16.msra.mxu0 %v887_v8  ;;  %852 = vmatpush3.bf16.msra.mxu1 %v900_v20  ;;  %v930_v58 = vld [vmem:[#allocation9] ss:$8 sps:$4 sm:$0xff]   ;;  %v932_v59 = vld [vmem:[#allocation9 + $0x4] ss:$8 sps:$4 sm:$0xff]   ;;  %v935_v60 = vld [vmem:[#allocation9 + $0x14] ss:$8 sps:$4 sm:$0xff]  }
  0x68   :  { %824 = vmatprep.subr.bf16.mxu0 %v888_v9  ;;  %853 = vmatprep.subr.bf16.mxu1 %v1095_v2  ;;  %v933_v61 = vld [vmem:[#allocation9 + $0x10] ss:$8 sps:$4 sm:$0xff]   ;;  %v938_v62 = vld [vmem:[#allocation9 + $0x24] ss:$8 sps:$4 sm:$0xff]   ;;  %v936_v63 = vld [vmem:[#allocation9 + $0x20] ss:$8 sps:$4 sm:$0xff]  }
  0x69   :  { %v941_v0 = vld [vmem:[#allocation9 + $0x34] ss:$8 sps:$4 sm:$0xff]   ;;  %v939_v1 = vld [vmem:[#allocation9 + $0x30] ss:$8 sps:$4 sm:$0xff]   ;;  %v942_v3 = vld [vmem:[#allocation9 + $0x40] ss:$8 sps:$4 sm:$0xff]  }
  0x6a   :  { %v947_v4 = vld [vmem:[#allocation9 + $0x54] ss:$8 sps:$4 sm:$0xff]   ;;  %v945_v5 = vld [vmem:[#allocation9 + $0x50] ss:$8 sps:$4 sm:$0xff]   ;;  %v775_v6 = vld [vmem:[%s1258_s4] ss:$0 sm:$0xff] }
  0x6b   :  { %825 = vmatpush3.bf16.msra.mxu0 %v889_v10  ;;  %854 = vmatpush3.bf16.msra.mxu1 %v901_v22  ;;  %v950_v17 = vld [vmem:[#allocation9 + $0x64] ss:$8 sps:$4 sm:$0xff]   ;;  %v951_v20 = vld [vmem:[#allocation9 + $0x70] ss:$8 sps:$4 sm:$0xff]  }
  0x6c   :  { %826 = vmatprep.subr.bf16.mxu0 %v890_v11  ;;  %855 = vmatprep.subr.bf16.mxu1 %v1095_v2 }
  0x6f   :  { %827 = vmatpush3.bf16.msra.mxu0 %v891_v15  ;;  %856 = vmatpush3.bf16.msra.mxu1 %v902_v24  ;;  %v430_v24 = vld [vmem:[%s1260_s6] sm:$0x3] }
  0x70   :  { %828 = vmatprep.subr.bf16.mxu0 %v892_v16  ;;  %857 = vmatprep.subr.bf16.mxu1 %v1095_v2 }
  0x73   :  { %829 = vmatpush3.bf16.msra.mxu0 %v893_v18  ;;  %858 = vmatpush3.bf16.msra.mxu1 %v903_v25  ;;  %v948_v18 = vld [vmem:[#allocation9 + $0x60] ss:$8 sps:$4 sm:$0xff]  }
  0x74   :  { %830 = vmatprep.subr.bf16.mxu0 %v894_v19  ;;  %859 = vmatprep.subr.bf16.mxu1 %v1095_v2  ;;  %v953_v19 = vld [vmem:[#allocation9 + $0x74] ss:$8 sps:$4 sm:$0xff]  }
  0x77   :  { %831 = vmatpush3.bf16.msra.mxu0 %v895_v21  ;;  %860 = vmatpush3.bf16.msra.mxu1 %v904_v26  ;;  %v432_v21 = vlaneseq }
  0x78   :  { %861 = vmatprep.subr.bf16.mxu1 %v1095_v2  ;;  %522 = vmatprep.subr.bf16.mxu0 %v908_v29  ;;  %v944_v2 = vld [vmem:[#allocation9 + $0x44] ss:$8 sps:$4 sm:$0xff]  }
  0x79   :  { %v433_v22 = vshrl.u32 %v432_v21, 7 }
  0x7a   :  { %285 = vmatmul.mubr.bf16.vlgmr.msra.gmra.mrb[0].mxu0 %v757_v23 }
  0x7b   :  { %862 = vmatpush3.bf16.msra.mxu1 %v905_v27  ;;  %523 = vmatpush1.bf16.msra.mxu0 %v906_v28  ;;  %v434_v23 = vsub.s32 0, %v433_v22  ;;  %v438_v25 = vsub.s32 1, %v433_v22 }
  0x7c   :  { %524 = vmatprep.subr.bf16.mxu0 %v911_v30  ;;  %554 = vmatprep.mubr.bf16.mxu0 %v1097_v57 }
  0x7d   :  { %682 = vmatprep.subr.bf16.mxu1 %v932_v59  ;;  %v435_v26 = vrot.slane %v430_v24, %v434_v23  ;;  %v439_v27 = vrot.slane %v430_v24, %v438_v25 }
  0x7f   :  { %525 = vmatpush1.bf16.msra.mxu0 %v909_v31 }
  0x80   :  { %526 = vmatprep.subr.bf16.mxu0 %v914_v32 }
  0x83   :  { %527 = vmatpush1.bf16.msra.mxu0 %v912_v33 }
  0x84   :  { %528 = vmatprep.subr.bf16.mxu0 %v917_v34  ;;  %v569_v34 = vstv %s755_s30 }
  0x87   :  { %529 = vmatpush1.bf16.msra.mxu0 %v915_v35 }
  0x88   :  { %530 = vmatprep.subr.bf16.mxu0 %v920_v36 }
  0x8b   :  { %531 = vmatpush1.bf16.msra.mxu0 %v918_v37 }
  0x8c   :  { %532 = vmatprep.subr.bf16.mxu0 %v923_v38 }
  0x8f   :  { %533 = vmatpush1.bf16.msra.mxu0 %v921_v39 }
  0x90   :  { %534 = vmatprep.subr.bf16.mxu0 %v926_v53 }
  0x93   :  { %535 = vmatpush1.bf16.msra.mxu0 %v924_v54 }
  0x94   :  { %536 = vmatprep.subr.bf16.mxu0 %v929_v55 }
  0x97   :  { %537 = vmatpush1.bf16.msra.mxu0 %v927_v56 }
 0x14d   :  { %v832_v40 = vpop.f32.mrb[0].mxu0 }
 0x14e   :  { %v833_v42 = vpop.f32.mrb[1].mxu0 }
 0x14f   :  { %v834_v43 = vadd.f32 %v833_v42, %v832_v40  ;;  %v835_v44 = vpop.f32.mrb[2].mxu0 }
 0x150   :  { %v836_v45 = vpop.f32.mrb[3].mxu0  ;;  %v590_v44 = vld [vmem:[%s1262_s8] sm:$0x3] }
 0x151   :  { %v287_v46 = vadd.f32 %v834_v43, %v756_v41  ;;  %v595_v45 = vrot.slane %v590_v44, %v434_v23 }
 0x153   :  { %v293_v48 = vmin.f32 %v287_v46, 0.0  ;;  %v292_v49 = vmax.f32 %v287_v46, 0.0  ;;  %v599_v46 = vrot.slane %v590_v44, %v438_v25 }
 0x155   :  { %v295_v50 = vmul.f32 %v1223_v47, %v293_v48 }
 0x157   :  { %v296_v51 = vadd.f32 %v295_v50, %v292_v49 }
 0x159   :  { %v297_v52 = vpack.c.bf16 %v296_v51, %v296_v51 }
 0x15b   :  { %864 = vmatmul.mubr.bf16.vlgmr.msra.gmra.mrb[0].mxu1 %v297_v52 }
 0x15c   :  { %714 = vmatprep.mubr.bf16.mxu1 %v1097_v57  ;;  %683 = vmatpush1.bf16.msra.mxu1 %v930_v58 }
 0x15d   :  { %684 = vmatprep.subr.bf16.mxu1 %v935_v60 }
 0x160   :  { %685 = vmatpush1.bf16.msra.mxu1 %v933_v61 }
 0x161   :  { %686 = vmatprep.subr.bf16.mxu1 %v938_v62 }
 0x164   :  { %687 = vmatpush1.bf16.msra.mxu1 %v936_v63 }
 0x165   :  { %688 = vmatprep.subr.bf16.mxu1 %v941_v0 }
 0x168   :  { %689 = vmatpush1.bf16.msra.mxu1 %v939_v1 }
 0x169   :  { %690 = vmatprep.subr.bf16.mxu1 %v944_v2 }
 0x16c   :  { %691 = vmatpush1.bf16.msra.mxu1 %v942_v3 }
 0x16d   :  { %692 = vmatprep.subr.bf16.mxu1 %v947_v4 }
 0x170   :  { %693 = vmatpush1.bf16.msra.mxu1 %v945_v5 }
 0x171   :  { %694 = vmatprep.subr.bf16.mxu1 %v950_v17 }
 0x174   :  { %695 = vmatpush1.bf16.msra.mxu1 %v948_v18 }
 0x175   :  { %696 = vmatprep.subr.bf16.mxu1 %v953_v19 }
 0x178   :  { %697 = vmatpush1.bf16.msra.mxu1 %v951_v20 }
 0x22e   :  { %v403_v7 = vpop.f32.mrb[0].mxu1 }
 0x22f   :  { %v404_v8 = vadd.f32 %v775_v6, %v403_v7  ;;  %v865_v9 = vpop.f32.mrb[1].mxu1 }
 0x230   :  { %v406_v10 = vpop.f32.mrb[2].mxu1 }
 0x231   :  { %v410_v11 = vmin.f32 %v404_v8, 0.0  ;;  %v866_v12 = vpop.f32.mrb[3].mxu1  ;;  %v409_v13 = vmax.f32 %v404_v8, 0.0 }
 0x233   :  { %v411_v14 = vmul.f32 %v410_v11, %v1223_v47 }
 0x235   :  { %v412_v15 = vadd.f32 %v411_v14, %v409_v13 }
 0x237   :  { %v413_v16 = vpack.c.bf16 %v412_v15, %v412_v15 }
 0x239   :  { %555 = vmatmul.mubr.bf16.vlgmr.msra.gmra.mrb[4].mxu0 %v413_v16 }
 0x30c   :  { %v556_v28 = vpop.f32.mrb[4].mxu0 }
 0x30d   :  { %v557_v29 = vadd.f32 %v556_v28, %v435_v26  ;;  %v558_v30 = vpop.f32.mrb[5].mxu0 }
 0x30e   :  { %v559_v31 = vadd.f32 %v558_v30, %v439_v27  ;;  %v560_v32 = vpop.f32.mrb[6].mxu0 }
 0x30f   :  { %v564_v33 = vmin.f32 %v557_v29, 0.0  ;;  %v561_v35 = vpop.f32.mrb[7].mxu0  ;;  %v563_v37 = vmax.f32 %v557_v29, 0.0 }
 0x310   :  { %v568_v36 = vmin.f32 %v559_v31, 0.0  ;;  %v567_v39 = vmax.f32 %v559_v31, 0.0 }
 0x311   :  { %v565_v38 = vmul.f32 %v564_v33, %v1223_v47 }
 0x312   :  { %v570_v40 = vmul.f32 %v569_v34, %v568_v36 }
 0x313   :  { %v566_v41 = vadd.f32 %v565_v38, %v563_v37 }
 0x314   :  { %v571_v42 = vadd.f32 %v570_v40, %v567_v39 }
 0x315   :  { %v573_v43 = vpack.c.bf16 %v566_v41, %v566_v41 }
 0x316   :  { %572 = vst [vmem:[%s1264_s10] sm:$0xff] %v571_v42  ;;  %s741_s10 = sshll.u32 %s1098_s22, 4  ;;  %s742_s10 = int_to_ptr.vmem [resolvable:$true] %s741_s10 }
 0x317   :  { %715 = vmatmul.mubr.bf16.vlgmr.msra.gmra.mrb[4].mxu1 %v573_v43  ;;  %s1054_s8 = scalar_lea.vmem %s742_s10, 256  ;;  %p1059_p10 = scmp.lt.s32.totalorder %s742_s10, %s742_s10 }
 0x318   :  { %p1055_p9 = scmp.ne.s32.totalorder %s742_s10, %s1054_s8  ;;  %p1060_p11 = scmp.lt.s32.totalorder %s1054_s8, %s1054_s8 }
 0x31a   :  { %p1061_p12 = por %p1060_p11, %p1059_p10 }
 0x31c   :  { %p1062_p13 = pnand %p1061_p12, %p1055_p9 }
 0x3ea   :  { %v716_v48 = vpop.f32.mrb[4].mxu1 }
 0x3eb   :  { %v717_v49 = vadd.f32 %v716_v48, %v595_v45  ;;  %v718_v50 = vpop.f32.mrb[5].mxu1 }
 0x3ec   :  { %v719_v51 = vadd.f32 %v718_v50, %v599_v46  ;;  %v720_v52 = vpop.f32.mrb[6].mxu1 }
 0x3ed   :  { %v725_v53 = vmin.f32 %v717_v49, 0.0  ;;  %v721_v54 = vpop.f32.mrb[7].mxu1  ;;  %v723_v56 = vmax.f32 %v717_v49, 0.0 }
 0x3ee   :  { %v726_v55 = vmin.f32 %v719_v51, 0.0  ;;  %v724_v58 = vmax.f32 %v719_v51, 0.0 }
 0x3ef   :  { %v727_v57 = vmul.f32 %v725_v53, %v1223_v47 }
 0x3f0   :  { %v728_v59 = vmul.f32 %v726_v55, %v1223_v47 }
 0x3f1   :  { %v729_v60 = vadd.f32 %v727_v57, %v723_v56 }
 0x3f2   :  { %v730_v61 = vadd.f32 %v728_v59, %v724_v58 }
 0x3f3   :  { %731 = vst [vmem:[#allocation12] sm:$0xff] %v729_v60 }
 0x3f4   :  { %732 = vst [vmem:[#allocation12 + $0x8] sm:$0xff] %v730_v61 }
 0x3f5   :  { %1065 = shalt.err (!%p1062_p13)
}
 0x3f6   :  { %s1066_s18 = scalar_lea.hbm %s1265_s11, 256 }
 0x3f7   :  { %p1067_p0 = scmp.ne.s32.totalorder %s1265_s11, %s1066_s18  ;;  %p1070_p1 = scmp.lt.u32.totalorder %s1066_s18, %s1265_s11 }
 0x3f9   :  { %p1072_p2 = pnand %p1070_p1, %p1067_p0 }
 0x3fb   :  { %1075 = shalt.err (!%p1072_p2)
}
 0x3fc   :  { %744 = dma.vmem_to_hbm [thread:$0]  %s742_s10, 256, %s1265_s11, [#allocation4]  }
 0x3fd   :  { %1084 = dma.done.wait [#allocation4], 256  }
 0x3fe   :  { %1085 = vsyncadd [#allocation4], 4294967040 }
 0x3ff   :  { %750 = vsyncpa [#allocation3], 1 }
 0x400   :  { %751 = vsyncpa [#allocation7], 1 }
 0x401   :  { %752 = vsyncpa [#allocation10], 1 }
 0x402   :  { %753 = vsyncpa [#allocation4], 1 }
 0x403   :  { %754 = vsyncpa [#allocation5], 1 }

</bundles_post_ra>
